<compile_context>
chip_gen: v7x
topology: tpu7x:2x2x1
jax: 0.10.0
libtpu: 0.0.40
codegen_flags: <defaults>
</compile_context>

<pallas_src>
import functools

import jax
import jax.numpy as jnp
from jax import lax
from jax.experimental import pallas as pl
from jax.experimental.pallas import tpu as pltpu


def _upscale_kernel(x_ref, b_ref, w_ref, o_ref, *, H, W):
    # x_ref: (1, C, H*W) f32   one sample; channels on sublanes, pixels on lanes
    # b_ref: (C, 1)      f32   -batch_mean (BN shift; BN scale is folded into w_ref)
    # w_ref: (Cout, Kpad) bf16 conv weight * BN scale, tap-major / channel-minor, zero-padded K
    # o_ref: (1, Cout, H*W) bf16  transposed conv output -> lane-dense stores
    C = x_ref.shape[1]
    HW = H * W
    Cout, Kpad = w_ref.shape

    # ---- BatchNorm shift + ReLU (f32); the per-channel scale lives in w_ref ----
    x = x_ref[...].reshape(C, HW)
    act = jnp.maximum(x + b_ref[...], 0.0)                      # (C, HW) f32

    # ---- hoisted boundary masks: validity of the shifted read for each tap ----
    lane = lax.broadcasted_iota(jnp.int32, (1, HW), 1)
    col = lane % W
    left_ok = col != 0           # tap kj=0 reads (w-1): invalid at w == 0
    right_ok = col != W - 1      # tap kj=2 reads (w+1): invalid at w == W-1
    top_ok = lane >= W           # tap ki=0 reads (h-1): invalid at h == 0
    bot_ok = lane < HW - W       # tap ki=2 reads (h+1): invalid at h == H-1

    # ---- im2col via in-register lane rotations (XLU) + masks; no VMEM scratch ----
    taps = []
    for ki in range(3):
        for kj in range(3):
            off = (ki - 1) * W + (kj - 1)
            # tap[i] = act[(i + off) mod HW]; wrapped positions are zeroed by the masks.
            tap = act if off == 0 else pltpu.roll(act, shift=(-off) % HW, axis=1)
            ms = []
            if ki == 0:
                ms.append(top_ok)
            if ki == 2:
                ms.append(bot_ok)
            if kj == 0:
                ms.append(left_ok)
            if kj == 2:
                ms.append(right_ok)
            if ms:
                m = ms[0]
                for e in ms[1:]:
                    m = jnp.logical_and(m, e)
                tap = jnp.where(m, tap, 0.0)
            taps.append(tap)
    if Kpad > 9 * C:
        taps.append(jnp.zeros((Kpad - 9 * C, HW), jnp.float32))
    patches = jnp.concatenate(taps, axis=0).astype(jnp.bfloat16)   # (Kpad, HW) bf16

    # ---- single MXU matmul, bf16 in / f32 accumulate, lane-dense (Cout, HW) out ----
    out_t = jnp.dot(w_ref[...], patches, preferred_element_type=jnp.float32)
    o_ref[...] = out_t.reshape(1, Cout, HW).astype(o_ref.dtype)


def upscale_forward(x_nchw, weight_hwio, scale_factor=2, eps=1e-5):
    """x_nchw: (N, C, H, W) float32. weight_hwio: (3, 3, C, C*scale^2).
    Returns (N, C, H*scale, W*scale) float32 (PyTorch pixel_shuffle semantics)."""
    N, C, H, W = x_nchw.shape
    r = scale_factor
    Cout = C * r * r
    assert weight_hwio.shape == (3, 3, C, Cout)
    HW = H * W

    x_nchw = x_nchw.astype(jnp.float32)

    # --- BatchNorm2d training mode (batch stats, biased var, gamma=1, beta=0); centered
    #     two-pass variance for numerical safety. (tiny XLA glue)
    mean = jnp.mean(x_nchw, axis=(0, 2, 3))
    var = jnp.mean(jnp.square(x_nchw - mean[None, :, None, None]), axis=(0, 2, 3))
    a = lax.rsqrt(var + eps)                                   # BN scale (gamma = 1)
    b2 = (-mean).reshape(C, 1).astype(jnp.float32)             # BN shift / a  (beta = 0)

    # Kernel consumes native NCHW flattened to (N, C, H*W): free reshape, no transpose.
    x_flat = x_nchw.reshape(N, C, HW)

    # Weight: fold BN scale per input channel, HWIO -> (Cout, 9*C) tap-major/channel-minor
    # columns matching the in-kernel im2col order; zero-pad K to a bf16-tile multiple.
    K = 9 * C
    Kpad = -(-K // 16) * 16
    w = weight_hwio.astype(jnp.float32) * a[None, None, :, None]
    w_t = jnp.transpose(w.reshape(K, Cout))                    # (Cout, 9C)
    w_t = jnp.pad(w_t, ((0, 0), (0, Kpad - K))).astype(jnp.bfloat16)

    kernel = functools.partial(_upscale_kernel, H=H, W=W)

    conv_t = pl.pallas_call(
        kernel,
        out_shape=jax.ShapeDtypeStruct((N, Cout, HW), jnp.bfloat16),
        grid_spec=pltpu.PrefetchScalarGridSpec(
            num_scalar_prefetch=0,
            grid=(N,),
            in_specs=[
                pl.BlockSpec((1, C, HW), lambda n: (n, 0, 0)),
                pl.BlockSpec((C, 1), lambda n: (0, 0)),
                pl.BlockSpec((Cout, Kpad), lambda n: (0, 0)),
            ],
            out_specs=pl.BlockSpec((1, Cout, HW), lambda n: (n, 0, 0)),
        ),
        compiler_params=pltpu.CompilerParams(
            dimension_semantics=("parallel",)),
    )(x_flat, b2, w_t)

    # --- pixel_shuffle glue (bf16, half the transpose bytes), then cast back to f32.
    y = conv_t.reshape(N, C, r, r, H, W)
    y = jnp.transpose(y, (0, 1, 4, 2, 5, 3))                   # (N, C, H, r, W, r)
    return y.reshape(N, C, H * r, W * r).astype(jnp.float32)


def _reference(x_nchw, weight_hwio, scale_factor=2, eps=1e-5):
    """Pure-JAX reference (BN train-mode -> ReLU -> conv -> pixel_shuffle)."""
    N, C, H, W = x_nchw.shape
    mean = jnp.mean(x_nchw, axis=(0, 2, 3))
    var = jnp.mean((x_nchw - mean[None, :, None, None]) ** 2, axis=(0, 2, 3))
    xn = (x_nchw - mean[None, :, None, None]) / jnp.sqrt(var + eps)[None, :, None, None]
    act = jnp.maximum(xn, 0.0)
    w_oihw = jnp.transpose(weight_hwio, (3, 2, 0, 1))
    conv = lax.conv_general_dilated(
        act, w_oihw, window_strides=(1, 1), padding=((1, 1), (1, 1)),
        dimension_numbers=("NCHW", "OIHW", "NCHW"),
        precision=lax.Precision.HIGHEST)
    r = scale_factor
    y = conv.reshape(N, C, r, r, H, W)
    y = jnp.transpose(y, (0, 1, 4, 2, 5, 3))
    return y.reshape(N, C, H * r, W * r)


if __name__ == "__main__":
    key = jax.random.PRNGKey(0)
    kx, kw = jax.random.split(key)

    N, C, H, W = 2, 8, 16, 16
    scale = 2
    Cout = C * scale * scale

    x = jax.random.normal(kx, (N, C, H, W), dtype=jnp.float32)
    # Deterministic synthetic conv weight (HWIO), no bias (bias=False in module).
    weight = (jax.random.normal(kw, (3, 3, C, Cout), dtype=jnp.float32) * 0.1)

    out = upscale_forward(x, weight, scale_factor=scale)
    out = jax.block_until_ready(out)

    assert out.shape == (N, C, H * scale, W * scale), out.shape

    ref = _reference(x, weight, scale_factor=scale)
    assert jnp.allclose(out, ref, rtol=2e-2, atol=2e-2), (
        float(jnp.max(jnp.abs(out - ref))))

    print("KERNEL_OK")
</pallas_src>

<mosaic_0001>
module attributes {stable_mosaic.version = 11 : i64} {
  func.func @_upscale_kernel(%arg0: i32, %arg1: memref<1x8x256xf32, #tpu.memory_space<vmem>>, %arg2: memref<8x1xf32, #tpu.memory_space<vmem>>, %arg3: memref<32x80xbf16, #tpu.memory_space<vmem>>, %arg4: memref<1x32x256xbf16, #tpu.memory_space<vmem>>) attributes {dimension_semantics = [#tpu.dimension_semantics<parallel>], iteration_bounds = array<i64: 2>, scalar_prefetch = 0 : i64, scratch_operands = 0 : i64, tpu.core_type = #tpu.core_type<tc>, window_params = [{transform_indices = @transform_0, window_bounds = array<i64: 1, 8, 256>}, {pipeline_mode = #tpu.pipeline_mode<synchronous>, transform_indices = @transform_1, window_bounds = array<i64: 8, 1>}, {pipeline_mode = #tpu.pipeline_mode<synchronous>, transform_indices = @transform_2, window_bounds = array<i64: 32, 80>}, {transform_indices = @transform_3, window_bounds = array<i64: 1, 32, 256>}]} {
    %c0 = arith.constant 0 : index
    %c0_0 = arith.constant 0 : index
    %c0_1 = arith.constant 0 : index
    %0 = vector.load %arg1[%c0, %c0_0, %c0_1] : memref<1x8x256xf32, #tpu.memory_space<vmem>>, vector<1x8x256xf32>
    %1 = vector.shape_cast %0 : vector<1x8x256xf32> to vector<8x256xf32>
    %c0_2 = arith.constant 0 : index
    %c0_3 = arith.constant 0 : index
    %2 = vector.load %arg2[%c0_2, %c0_3] : memref<8x1xf32, #tpu.memory_space<vmem>>, vector<8x1xf32>
    %3 = vector.broadcast %2 : vector<8x1xf32> to vector<8x256xf32>
    %4 = arith.addf %1, %3 : vector<8x256xf32>
    %cst = arith.constant 0.000000e+00 : f32
    %5 = vector.broadcast %cst : f32 to vector<8x256xf32>
    %6 = arith.maximumf %4, %5 : vector<8x256xf32>
    %7 = tpu.iota {dimensions = array<i32: 1>} : vector<1x256xi32>
    %c16_i32 = arith.constant 16 : i32
    %c0_i32 = arith.constant 0 : i32
    %8 = arith.cmpi eq, %c16_i32, %c0_i32 : i32
    %c1_i32 = arith.constant 1 : i32
    %9 = arith.select %8, %c1_i32, %c16_i32 : i32
    %10 = vector.broadcast %9 : i32 to vector<1x256xi32>
    %11 = arith.remsi %7, %10 : vector<1x256xi32>
    %c0_i32_4 = arith.constant 0 : i32
    %12 = vector.broadcast %c0_i32_4 : i32 to vector<1x256xi32>
    %13 = arith.cmpi ne, %11, %12 : vector<1x256xi32>
    %c0_i32_5 = arith.constant 0 : i32
    %14 = vector.broadcast %c0_i32_5 : i32 to vector<1x256xi32>
    %15 = arith.cmpi slt, %11, %14 : vector<1x256xi32>
    %c0_i32_6 = arith.constant 0 : i32
    %16 = arith.cmpi slt, %9, %c0_i32_6 : i32
    %17 = vector.broadcast %16 : i1 to vector<1x256xi1>
    %18 = vector.broadcast %17 : vector<1x256xi1> to vector<1x256xi1>
    %19 = arith.xori %15, %18 : vector<1x256xi1>
    %20 = arith.andi %19, %13 : vector<1x256xi1>
    %21 = vector.broadcast %9 : i32 to vector<1x256xi32>
    %22 = arith.addi %11, %21 : vector<1x256xi32>
    %23 = arith.select %20, %22, %11 : vector<1x256xi1>, vector<1x256xi32>
    %c0_i32_7 = arith.constant 0 : i32
    %24 = vector.broadcast %c0_i32_7 : i32 to vector<1x256xi32>
    %25 = arith.cmpi ne, %23, %24 : vector<1x256xi32>
    %c15_i32 = arith.constant 15 : i32
    %26 = vector.broadcast %c15_i32 : i32 to vector<1x256xi32>
    %27 = arith.cmpi ne, %23, %26 : vector<1x256xi32>
    %c16_i32_8 = arith.constant 16 : i32
    %28 = vector.broadcast %c16_i32_8 : i32 to vector<1x256xi32>
    %29 = arith.cmpi sge, %7, %28 : vector<1x256xi32>
    %c240_i32 = arith.constant 240 : i32
    %30 = vector.broadcast %c240_i32 : i32 to vector<1x256xi32>
    %31 = arith.cmpi slt, %7, %30 : vector<1x256xi32>
    %c17_i32 = arith.constant 17 : i32
    %32 = tpu.dynamic_rotate %6 by %c17_i32 dim 1 : vector<8x256xf32>, i32 -> vector<8x256xf32>
    %33 = arith.andi %29, %25 : vector<1x256xi1>
    %cst_9 = arith.constant 0.000000e+00 : f32
    %34 = vector.shape_cast %33 : vector<1x256xi1> to vector<1x256xi1>
    %35 = vector.broadcast %34 : vector<1x256xi1> to vector<8x256xi1>
    %36 = vector.broadcast %cst_9 : f32 to vector<8x256xf32>
    %37 = arith.select %35, %32, %36 : vector<8x256xi1>, vector<8x256xf32>
    %c16_i32_10 = arith.constant 16 : i32
    %38 = tpu.dynamic_rotate %6 by %c16_i32_10 dim 1 : vector<8x256xf32>, i32 -> vector<8x256xf32>
    %cst_11 = arith.constant 0.000000e+00 : f32
    %39 = vector.shape_cast %29 : vector<1x256xi1> to vector<1x256xi1>
    %40 = vector.broadcast %39 : vector<1x256xi1> to vector<8x256xi1>
    %41 = vector.broadcast %cst_11 : f32 to vector<8x256xf32>
    %42 = arith.select %40, %38, %41 : vector<8x256xi1>, vector<8x256xf32>
    %c15_i32_12 = arith.constant 15 : i32
    %43 = tpu.dynamic_rotate %6 by %c15_i32_12 dim 1 : vector<8x256xf32>, i32 -> vector<8x256xf32>
    %44 = arith.andi %29, %27 : vector<1x256xi1>
    %cst_13 = arith.constant 0.000000e+00 : f32
    %45 = vector.shape_cast %44 : vector<1x256xi1> to vector<1x256xi1>
    %46 = vector.broadcast %45 : vector<1x256xi1> to vector<8x256xi1>
    %47 = vector.broadcast %cst_13 : f32 to vector<8x256xf32>
    %48 = arith.select %46, %43, %47 : vector<8x256xi1>, vector<8x256xf32>
    %c1_i32_14 = arith.constant 1 : i32
    %49 = tpu.dynamic_rotate %6 by %c1_i32_14 dim 1 : vector<8x256xf32>, i32 -> vector<8x256xf32>
    %cst_15 = arith.constant 0.000000e+00 : f32
    %50 = vector.shape_cast %25 : vector<1x256xi1> to vector<1x256xi1>
    %51 = vector.broadcast %50 : vector<1x256xi1> to vector<8x256xi1>
    %52 = vector.broadcast %cst_15 : f32 to vector<8x256xf32>
    %53 = arith.select %51, %49, %52 : vector<8x256xi1>, vector<8x256xf32>
    %c255_i32 = arith.constant 255 : i32
    %54 = tpu.dynamic_rotate %6 by %c255_i32 dim 1 : vector<8x256xf32>, i32 -> vector<8x256xf32>
    %cst_16 = arith.constant 0.000000e+00 : f32
    %55 = vector.shape_cast %27 : vector<1x256xi1> to vector<1x256xi1>
    %56 = vector.broadcast %55 : vector<1x256xi1> to vector<8x256xi1>
    %57 = vector.broadcast %cst_16 : f32 to vector<8x256xf32>
    %58 = arith.select %56, %54, %57 : vector<8x256xi1>, vector<8x256xf32>
    %c241_i32 = arith.constant 241 : i32
    %59 = tpu.dynamic_rotate %6 by %c241_i32 dim 1 : vector<8x256xf32>, i32 -> vector<8x256xf32>
    %60 = arith.andi %31, %25 : vector<1x256xi1>
    %cst_17 = arith.constant 0.000000e+00 : f32
    %61 = vector.shape_cast %60 : vector<1x256xi1> to vector<1x256xi1>
    %62 = vector.broadcast %61 : vector<1x256xi1> to vector<8x256xi1>
    %63 = vector.broadcast %cst_17 : f32 to vector<8x256xf32>
    %64 = arith.select %62, %59, %63 : vector<8x256xi1>, vector<8x256xf32>
    %c240_i32_18 = arith.constant 240 : i32
    %65 = tpu.dynamic_rotate %6 by %c240_i32_18 dim 1 : vector<8x256xf32>, i32 -> vector<8x256xf32>
    %cst_19 = arith.constant 0.000000e+00 : f32
    %66 = vector.shape_cast %31 : vector<1x256xi1> to vector<1x256xi1>
    %67 = vector.broadcast %66 : vector<1x256xi1> to vector<8x256xi1>
    %68 = vector.broadcast %cst_19 : f32 to vector<8x256xf32>
    %69 = arith.select %67, %65, %68 : vector<8x256xi1>, vector<8x256xf32>
    %c239_i32 = arith.constant 239 : i32
    %70 = tpu.dynamic_rotate %6 by %c239_i32 dim 1 : vector<8x256xf32>, i32 -> vector<8x256xf32>
    %71 = arith.andi %31, %27 : vector<1x256xi1>
    %cst_20 = arith.constant 0.000000e+00 : f32
    %72 = vector.shape_cast %71 : vector<1x256xi1> to vector<1x256xi1>
    %73 = vector.broadcast %72 : vector<1x256xi1> to vector<8x256xi1>
    %74 = vector.broadcast %cst_20 : f32 to vector<8x256xf32>
    %75 = arith.select %73, %70, %74 : vector<8x256xi1>, vector<8x256xf32>
    %cst_21 = arith.constant 0.000000e+00 : f32
    %76 = vector.broadcast %cst_21 : f32 to vector<8x256xf32>
    %77 = tpu.concatenate %37, %42, %48, %53, %6, %58, %64, %69, %75, %76 in 0 : vector<8x256xf32>, vector<8x256xf32>, vector<8x256xf32>, vector<8x256xf32>, vector<8x256xf32>, vector<8x256xf32>, vector<8x256xf32>, vector<8x256xf32>, vector<8x256xf32>, vector<8x256xf32> -> vector<80x256xf32>
    %78 = arith.truncf %77 : vector<80x256xf32> to vector<80x256xbf16>
    %c0_22 = arith.constant 0 : index
    %c0_23 = arith.constant 0 : index
    %79 = vector.load %arg3[%c0_22, %c0_23] : memref<32x80xbf16, #tpu.memory_space<vmem>>, vector<32x80xbf16>
    %cst_24 = arith.constant dense<0.000000e+00> : vector<32x256xf32>
    %80 = tpu.matmul %79, %78, %cst_24 {dimension_numbers = #tpu.dot_dimension_numbers<[1], [0], [0], [1], [0, 0, 1, 1], [], []>} : vector<32x80xbf16>, vector<80x256xbf16>, vector<32x256xf32> -> vector<32x256xf32>
    %81 = vector.shape_cast %80 : vector<32x256xf32> to vector<1x32x256xf32>
    %82 = arith.truncf %81 : vector<1x32x256xf32> to vector<1x32x256xbf16>
    %c0_25 = arith.constant 0 : index
    %c0_26 = arith.constant 0 : index
    %c0_27 = arith.constant 0 : index
    %83 = vector.load %arg4[%c0_25, %c0_26, %c0_27] : memref<1x32x256xbf16, #tpu.memory_space<vmem>>, vector<1x32x256xbf16>
    tpu.vector_store %arg4[%c0_25, %c0_26, %c0_27], %82 {strides = array<i32>} : memref<1x32x256xbf16, #tpu.memory_space<vmem>>, vector<1x32x256xbf16>,
    return
  }
  func.func @transform_0(%arg0: i32) -> (i32, i32, i32) {
    %c0_i32 = arith.constant 0 : i32
    %c0_i32_0 = arith.constant 0 : i32
    %c0_i32_1 = arith.constant 0 : i32
    return %arg0, %c0_i32, %c0_i32_0 : i32, i32, i32
  }
  func.func @transform_1(%arg0: i32) -> (i32, i32) {
    %c0_i32 = arith.constant 0 : i32
    %c0_i32_0 = arith.constant 0 : i32
    %c0_i32_1 = arith.constant 0 : i32
    return %c0_i32, %c0_i32_0 : i32, i32
  }
  func.func @transform_2(%arg0: i32) -> (i32, i32) {
    %c0_i32 = arith.constant 0 : i32
    %c0_i32_0 = arith.constant 0 : i32
    %c0_i32_1 = arith.constant 0 : i32
    return %c0_i32, %c0_i32_0 : i32, i32
  }
  func.func @transform_3(%arg0: i32) -> (i32, i32, i32) {
    %c0_i32 = arith.constant 0 : i32
    %c0_i32_0 = arith.constant 0 : i32
    %c0_i32_1 = arith.constant 0 : i32
    return %arg0, %c0_i32, %c0_i32_0 : i32, i32, i32
  }
}

</mosaic_0001>

<bundles_post_ra>
// kernel: tpu_custom_call.1
= control target key start
LH: loop header
LB: loop body
LE: loop exit
PB: predicated region body
PF: predicated region fallthrough
CT: control target
= control target key end

     0   :  { %8 = vsyncpa [#allocation3], 0  ;;  %s1175_s0 = inlined_call_operand.hbm [shape: f32[2,8,256], index: 0, kind: input, shape index: {}]   ;;  %s1176_s1 = inlined_call_operand.vmem [shape: f32[8,1], index: 1, kind: input, shape index: {}]   ;;  %s1177_s2 = inlined_call_operand.vmem [shape: bf16[32,80], index: 2, kind: input, shape index: {}]   ;;  %s1178_s3 = inlined_call_operand.hbm [shape: bf16[2,32,256], index: 3, kind: output, shape index: {}]  }
   0x1   :  { %10 = vsyncpa [#allocation3 + $0x1], 0 }
   0x2   :  { %11 = vsyncpa [#allocation4], 0 }
   0x3   :  { %13 = vsyncpa [#allocation4 + $0x1], 0  ;;  %s849_s12 = smov 0   ;;  %s851_s13 = smov 0  }
   0x4   :  { %s853_s14 = smov 0   ;;  %s855_s15 = smov 0  }
   0x5 LB: > { %s870_s16 = sadd.s32 4294967295, %s812_s15   ;;  %s546_s17 = sadd.s32 4294967294, %s812_s15   ;;  %s812_s15 = sphi %s855_s15, %s1211_s15   ;;  %s808_s14 = sphi %s853_s14, %s1210_s14   ;;  %s804_s13 = sphi %s851_s13, %s1209_s13   ;;  %s800_s12 = sphi %s849_s12, %s1208_s12  }
   0x6   : > { %s874_s18 = sadd.s32 1, %s812_s15   ;;  %s26_s19 = sadd.s32 1, %s808_s14 }
   0x7   : > { %s23_s20 = ssub.s32 %s812_s15, %s874_s18  ;;  %p33_p0 = scmp.ne.s32.totalorder %s808_s14, %s804_s13 }
   0x8   : > { %p24_p1 = scmp.eq.s32.totalorder %s23_s20, 0  ;;  %p34_p2 = scmp.eq.s32.totalorder %s812_s15, 0 }
   0x9   : > { %p39_p3 = scmp.ne.s32.totalorder %s804_s13, %s800_s12  ;;  %p40_p4 = scmp.eq.s32.totalorder %s870_s16, 0 }
   0xa   : > { %s886_s21 = scalar_select %p24_p1, %s808_s14, %s26_s19  }
   0xb   : > { %p888_p5 = por %p34_p2, %p33_p0  ;;  %p892_p6 = por %p40_p4, %p39_p3 }
   0xc   : > { %p105_p7 = scmp.eq.s32.totalorder %s870_s16, 1  ;;  %p111_p8 = scmp.eq.s32.totalorder %s546_s17, 1 }
   0xd   : > { %p626_p10 = scmp.lt.s32.totalorder %s812_s15, 2  ;;  %s137_s26 = sand.u32 1, %s808_s14  }
   0xe   : > { %p899_p11 = por %p105_p7, %p33_p0  ;;  %p903_p12 = por %p111_p8, %p39_p3 }
   0xf   : > { %s598_s27 = sshll.u32 %s812_s15, 8  ;;  %s549_s28 = sshll.u32 %s137_s26, 4 }
  0x10   : > { %s1182_s24 = scalar_select %p899_p11, 1, 0 }
  0x11   : > { %s1183_s25 = scalar_select %p903_p12, 1, 0 }
  0x12   : > { %s912_s4 = scalar_lea.hbm %s1175_s0, %s598_s27  ;;  %s141_s5 = scalar_lea.vmem [#allocation2], %s549_s28 }
  0x13   : > { %s149_s6 = sshll.u32 %s141_s5, 4  ;;  %p916_p13 = pnand %p626_p10, %p888_p5  ;;  %s920_s6 = int_to_ptr.vmem [resolvable:$true] %s149_s6 }
  0x14   : > { %s138_s8 = scalar_lea.sflag [#allocation3], %s137_s26  ;;  %s716_s9 = scalar_lea.hbm %s912_s4, 256 }
  0x15   : > { %p717_p2 = scmp.ne.s32.totalorder %s912_s4, %s716_s9  ;;  %p718_p3 = pneg %p916_p13 }
  0x16   : > { %s721_s17 = scalar_lea.hbm %s1175_s0, 512  ;;  %p722_p5 = scmp.lt.u32.totalorder %s912_s4, %s1175_s0 }
  0x17   : > { %p719_p4 = pnand %p718_p3, %p717_p2  ;;  %p723_p8 = scmp.lt.u32.totalorder %s721_s17, %s716_s9 }
  0x18   : > { %p725_p9 = scmp.lt.u32.totalorder %s716_s9, %s912_s4 }
  0x19   : > { %p720_p7 = pneg %p719_p4  ;;  %p724_p10 = por %p723_p8, %p722_p5 }
  0x1b   : > { %p726_p0 = por %p725_p9, %p724_p10 }
  0x1d   : > { %p727_p1 = pnand %p726_p0, %p720_p7 }
  0x1f   : > { %730 = shalt.err (!%p727_p1)
}
  0x20   : > { %s731_s22 = scalar_lea.vmem %s920_s6, 256  ;;  %s814_s26 = smov [#allocation2]  }
  0x21   : > { %p732_p2 = scmp.ne.s32.totalorder %s920_s6, %s731_s22  ;;  %s736_s27 = sshll.u32 %s814_s26, 4  ;;  %s737_s27 = int_to_ptr.vmem [resolvable:$false] %s736_s27 }
  0x22   : > { %s738_s28 = scalar_lea.vmem %s737_s27, 512  ;;  %p739_p11 = scmp.lt.s32.totalorder %s920_s6, %s737_s27 }
  0x23   : > { %p734_p4 = pnand %p732_p2, %p718_p3  ;;  %p740_p5 = scmp.lt.s32.totalorder %s738_s28, %s731_s22 }
  0x25   : > { %p735_p12 = pneg %p734_p4  ;;  %p741_p8 = por %p740_p5, %p739_p11 }
  0x27   : > { %p742_p9 = pnand %p741_p8, %p735_p12 }
  0x29   : > { %745 = shalt.err (!%p742_p9)
}
  0x2a   : > { %621 = dma.hbm_to_vmem [thread:$0]  (!%p916_p13), %s912_s4, 256, %s920_s6, %s138_s8  }
  0x2b   : > { %p1185_p0 = scmp.lt.s32.totalorder %s812_s15, 3  ;;  %p1186_p1 = scmp.ge.s32.totalorder %s812_s15, 1 }
  0x2d   : > { %p155_p3 = pnand %p1186_p1, %p1185_p0 }
  0x2e   : > { %s954_s29 = sand.u32 (!%p155_p3), 1, %s804_s13  }
  0x2f   : > { %158 = sbr.rel (%p155_p3) target bundleno = 564 (0x234), region = 32  ;;  %s553_s30 = sshll.u32 (!%p155_p3), %s954_s29, 4 }
  0x30   : > { %s161_s5 = scalar_lea.sflag (!%p155_p3), [#allocation3], %s954_s29  ;;  %s164_s9 = scalar_lea.vmem (!%p155_p3), [#allocation2], %s553_s30 }
  0x36   : > { %791 = dma.done.wait (%p892_p6), %s161_s5, 256  }
  0x37   : > { %793 = vsyncadd (%p892_p6), %s161_s5, 4294967040  ;;  %v815_v0 = vmov 0   ;;  %v190_v1 = vld [vmem:[%s1176_s1] sm:$0xff]  ;;  %v189_v3 = vld [vmem:[%s164_s9 + $0x8] sm:$0xff]  ;;  %s816_s23 = smov 16   ;;  %s817_s7 = smov 17   ;;  %v200_v10 = vlaneseq }
  0x38   : > { %673 = vset.pattern.permute.xlu0 %v815_v0  ;;  %410 = vmatprep.mubr.bf16.mxu0 %v815_v0  ;;  %v188_v2 = vld [vmem:[%s164_s9] sm:$0xff]  ;;  %s818_s8 = smov 15   ;;  %s819_s10 = smov 1   ;;  %vm824_vm8 = vmmov 1  }
  0x39   : > { %420 = vmatprep.mubr.bf16.mxu1 %v815_v0  ;;  %193 = vperm.xlu0 %673, %v190_v1   ;;  %s820_s11 = smov 127   ;;  %s821_s17 = smov 113   ;;  %v975_v11 = vand.u32 127, %v200_v10 }
  0x3a   : > { %s822_s19 = smov 112   ;;  %s823_s20 = smov 111  }
  0x3b   : > { %v978_v12 = vadd.s32 128, %v975_v11  ;;  %v207_v13 = vand.u32 15, %v975_v11  ;;  %vm231_vm1 = vcmp.ge.s32.totalorder %v975_v11, 16  ;;  %vm239_vm3 = vcmp.lt.s32.totalorder %v975_v11, 17  ;;  %s554_s30 = sshll.u32 %s954_s29, 5  ;;  %s603_s4 = sshll.u32 %s870_s16, 9 }
  0x3c   : > { %vm254_vm4 = vcmp.lt.s32.totalorder %v975_v11, 16  ;;  %vm267_vm6 = vcmp.lt.s32.totalorder %v975_v11, 15  ;;  %vm282_vm10 = vcmp.lt.s32.totalorder %v975_v11, 1  ;;  %vm295_vm15 = vcmp.lt.s32.totalorder %v975_v11, 127  ;;  %s186_s5 = scalar_lea.vmem [#allocation5], %s554_s30  ;;  %s1131_s16 = scalar_lea.hbm %s1178_s3, %s603_s4 }
  0x3d   : > { %v214_v14 = vand.u32 15, %v978_v12  ;;  %vm982_vm0 = vcmp.ne.s32.totalorder %v207_v13, 0  ;;  %vm998_vm7 = vcmp.ne.s32.totalorder %v207_v13, 15  ;;  %s473_s9 = sshll.u32 %s186_s5, 4  ;;  %p1205_p11 = scmp.ne.s32.totalorder %s1182_s24, 0  ;;  %s1126_s9 = int_to_ptr.vmem [resolvable:$true] %s473_s9 }
  0x3e   : > { %vm242_vm5 = vmand %vm231_vm1, %vm982_vm0 }
  0x3f   : > { %vm987_vm2 = vcmp.ne.s32.totalorder %v214_v14, 0  ;;  %vm1012_vm11 = vmpackc.low %vm231_vm1, %vm242_vm5  ;;  %vm1016_vm12 = vcmp.ne.s32.totalorder %v214_v14, 15  ;;  %vm308_vm5 = vcmp.lt.s32.totalorder %v975_v11, 113 }
  0x40   : > { %vm1005_vm9 = vmpackc.low %vm824_vm8, %vm987_vm2 }
  0x41   : > { %vm1024_vm13 = vmand %vm231_vm1, %vm998_vm7 }
  0x42   : > { %vm563_vm14 = vmpackc.low %vm987_vm2, %vm1016_vm12 }
  0x43   : > { %vm566_vm1 = vmpackc.low %vm982_vm0, %vm1024_vm13 }
  0xb8   : > { %v194_v4 = vpop.permute.xlu0 %193 }
  0xb9   : > { %v965_v5 = vadd.f32 %v194_v4, %v188_v2  ;;  %v967_v6 = vadd.f32 %v194_v4, %v189_v3 }
  0xbb   : > { %v198_v7 = vmax.f32 %v965_v5, 0.0  ;;  %v199_v8 = vmax.f32 %v967_v6, 0.0 }
  0xbd   : > { %v679_v9 = vpack.i.bf16 %v199_v8, %v198_v7 }
  0xbf   : > { %680 = vrot.lane.b32.xlu1 %v679_v9, %s816_s23  ;;  %675 = vrot.lane.b32.xlu0 %v679_v9, %s817_s7  ;;  %s460_s7 = scalar_lea.sflag [#allocation4], %s954_s29 }
  0xc3   : > { %685 = vrot.lane.b32.xlu1 %v679_v9, %s818_s8  ;;  %690 = vrot.lane.b32.xlu0 %v679_v9, %s819_s10  ;;  %s746_s8 = scalar_lea.vmem %s1126_s9, 512  ;;  %s826_s10 = smov [#allocation5]  }
  0xc4   : > { %p747_p6 = scmp.ne.s32.totalorder %s1126_s9, %s746_s8 }
  0xc6   : > { %p748_p12 = pnand %p747_p6, %p1205_p11 }
  0xc7   : > { %695 = vrot.lane.b32.xlu1 %v679_v9, %s820_s11  ;;  %700 = vrot.lane.b32.xlu0 %v679_v9, %s821_s17  ;;  %s750_s11 = sshll.u32 %s826_s10, 4  ;;  %s751_s11 = int_to_ptr.vmem [resolvable:$false] %s750_s11 }
  0xc8   : > { %p749_p13 = pneg %p748_p12  ;;  %s752_s17 = scalar_lea.vmem %s751_s11, 1024 }
  0xc9   : > { %p753_p7 = scmp.lt.s32.totalorder %s1126_s9, %s751_s11  ;;  %p754_p10 = scmp.lt.s32.totalorder %s752_s17, %s746_s8 }
  0xcb   : > { %705 = vrot.lane.b32.xlu1 %v679_v9, %s822_s19  ;;  %710 = vrot.lane.b32.xlu0 %v679_v9, %s823_s20  ;;  %p755_p2 = por %p754_p10, %p753_p7 }
  0xcd   : > { %p756_p4 = pnand %p755_p2, %p749_p13 }
 0x131   : > { %v681_v16 = vpop.permute.xlu1 %680  ;;  %v676_v17 = vpop.permute.xlu0 %675 }
 0x132   : > { %v683_v19 = vunpack.i.h.bf16 %v681_v16  ;;  %v682_v20 = vunpack.i.l.bf16 %v681_v16  ;;  %v678_v21 = vunpack.i.h.bf16 %v676_v17  ;;  %v677_v22 = vunpack.i.l.bf16 %v676_v17 }
 0x134   : > { %v240_v24 = vsel %vm239_vm3, %v677_v22, %v678_v21  ;;  %v255_v25 = vsel %vm254_vm4, %v682_v20, %v683_v19  ;;  %v241_v27 = vsel %vm239_vm3, %v678_v21, %v677_v22  ;;  %v256_v28 = vsel %vm254_vm4, %v683_v19, %v682_v20  ;;  %vm1057_vm4 = vmpackc.low %vm1016_vm12, %vm824_vm8 }
 0x135   : > { %v686_v29 = vpop.permute.xlu1 %685  ;;  %v691_v30 = vpop.permute.xlu0 %690  ;;  %v558_v31 = vpack.c.bf16 %v255_v25, %v240_v24  ;;  %v561_v33 = vpack.c.bf16 %v256_v28, %v241_v27  ;;  %vm234_vm3 = vcmp.lt.s32.totalorder %v978_v12, 240  ;;  %v715_v12 = vld [vmem:[%s1177_s2 + $0x8] sm:$0xff]  }
 0x136   : > { %v688_v35 = vunpack.i.h.bf16 %v686_v29  ;;  %v687_v36 = vunpack.i.l.bf16 %v686_v29  ;;  %v693_v37 = vunpack.i.h.bf16 %v691_v30  ;;  %v692_v38 = vunpack.i.l.bf16 %v691_v30  ;;  %vm340_vm13 = vmand %vm234_vm3, %vm1016_vm12 }
 0x137   : > { %559 = vmatprep.subr.msk.bf16.mxu0 %vm1005_vm9, %v558_v31  ;;  %604 = vmatprep.subr.msk.bf16.mxu1 %vm1005_vm9, %v558_v31  ;;  %vm323_vm9 = vcmp.lt.s32.totalorder %v975_v11, 112  ;;  %vm578_vm12 = vmpackc.low %vm824_vm8, %vm982_vm0  ;;  %vm371_vm0 = vcmask 654336  }
 0x138   : > { %v268_v40 = vsel %vm267_vm6, %v687_v36, %v688_v35  ;;  %v269_v41 = vsel %vm267_vm6, %v688_v35, %v687_v36  ;;  %v283_v42 = vsel %vm282_vm10, %v692_v38, %v693_v37  ;;  %v284_v43 = vsel %vm282_vm10, %v693_v37, %v692_v38  ;;  %562 = vmatpush1.bf16.msk.msra.mxu0 %vm1012_vm11, %v561_v33  ;;  %vm1070_vm6 = vmpackc.low %vm998_vm7, %vm824_vm8 }
 0x139   : > { %v564_v44 = vpack.c.bf16 %v283_v42, %v268_v40  ;;  %v567_v45 = vpack.c.bf16 %v284_v43, %v269_v41  ;;  %609 = vmatpush1.bf16.msk.msra.mxu1 %vm1012_vm11, %v561_v33  ;;  %v696_v46 = vpop.permute.xlu1 %695  ;;  %v701_v47 = vpop.permute.xlu0 %700  ;;  %vm336_vm10 = vcmp.lt.s32.totalorder %v975_v11, 111  ;;  %vm312_vm11 = vmand %vm234_vm3, %vm987_vm2  ;;  %v714_v11 = vld [vmem:[%s1177_s2] sm:$0xff]  }
 0x13a   : > { %v698_v48 = vunpack.i.h.bf16 %v696_v46  ;;  %v697_v49 = vunpack.i.l.bf16 %v696_v46  ;;  %v703_v50 = vunpack.i.h.bf16 %v701_v47  ;;  %v702_v51 = vunpack.i.l.bf16 %v701_v47  ;;  %vm575_vm2 = vmpackc.low %vm234_vm3, %vm312_vm11 }
 0x13b   : > { %565 = vmatprep.subr.msk.bf16.mxu0 %vm563_vm14, %v564_v44  ;;  %605 = vmatprep.subr.msk.bf16.mxu1 %vm563_vm14, %v564_v44  ;;  %vm581_vm14 = vmpackc.low %vm824_vm8, %vm340_vm13 }
 0x13c   : > { %v296_v53 = vsel %vm295_vm15, %v697_v49, %v698_v48  ;;  %v297_v54 = vsel %vm295_vm15, %v698_v48, %v697_v49  ;;  %568 = vmatpush1.bf16.msk.msra.mxu0 %vm566_vm1, %v567_v45  ;;  %v309_v0 = vsel %vm308_vm5, %v702_v51, %v703_v50  ;;  %v310_v1 = vsel %vm308_vm5, %v703_v50, %v702_v51  ;;  %vm584_vm15 = vmpackc.low %vm824_vm8, %vm998_vm7 }
 0x13d   : > { %v570_v56 = vpack.c.bf16 %v297_v54, %v199_v8  ;;  %v573_v57 = vpack.c.bf16 %v296_v53, %v198_v7  ;;  %610 = vmatpush1.bf16.msk.msra.mxu1 %vm566_vm1, %v567_v45  ;;  %v706_v58 = vpop.permute.xlu1 %705  ;;  %v711_v59 = vpop.permute.xlu0 %710  ;;  %v825_v8 = vmov 0.0  }
 0x13e   : > { %v708_v60 = vunpack.i.h.bf16 %v706_v58  ;;  %v707_v61 = vunpack.i.l.bf16 %v706_v58  ;;  %v713_v62 = vunpack.i.h.bf16 %v711_v59  ;;  %v712_v63 = vunpack.i.l.bf16 %v711_v59 }
 0x13f   : > { %571 = vmatprep.subr.msk.bf16.mxu0 %vm1057_vm4, %v570_v56  ;;  %606 = vmatprep.subr.msk.bf16.mxu1 %vm1057_vm4, %v570_v56 }
 0x140   : > { %v324_v2 = vsel %vm323_vm9, %v707_v61, %v708_v60  ;;  %v325_v3 = vsel %vm323_vm9, %v708_v60, %v707_v61  ;;  %v338_v4 = vsel %vm336_vm10, %v713_v62, %v712_v63  ;;  %574 = vmatpush1.bf16.msk.msra.mxu0 %vm1070_vm6, %v573_v57  ;;  %v337_v7 = vsel %vm336_vm10, %v712_v63, %v713_v62 }
 0x141   : > { %v576_v5 = vpack.c.bf16 %v325_v3, %v310_v1  ;;  %v579_v6 = vpack.c.bf16 %v324_v2, %v309_v0  ;;  %611 = vmatpush1.bf16.msk.msra.mxu1 %vm1070_vm6, %v573_v57  ;;  %v582_v9 = vpack.c.bf16 %v825_v8, %v338_v4  ;;  %v585_v10 = vpack.c.bf16 %v825_v8, %v337_v7 }
 0x143   : > { %577 = vmatprep.subr.msk.bf16.mxu0 %vm575_vm2, %v576_v5  ;;  %607 = vmatprep.subr.msk.bf16.mxu1 %vm575_vm2, %v576_v5 }
 0x144   : > { %580 = vmatpush1.bf16.msk.msra.mxu0 %vm578_vm12, %v579_v6 }
 0x145   : > { %612 = vmatpush1.bf16.msk.msra.mxu1 %vm578_vm12, %v579_v6  ;;  %583 = vmatprep.subr.msk.bf16.mxu0 %vm581_vm14, %v582_v9 }
 0x146   : > { %608 = vmatprep.subr.msk.bf16.mxu1 %vm581_vm14, %v582_v9 }
 0x148   : > { %586 = vmatpush1.bf16.msk.msra.mxu0 %vm584_vm15, %v585_v10 }
 0x149   : > { %613 = vmatpush1.bf16.msk.msra.mxu1 %vm584_vm15, %v585_v10 }
 0x14b   : > { %587 = vmatmul.mubr.msk.bf16.vlgmr.msra.gmra.mrb[0].mxu0 %vm371_vm0, %v714_v11 }
 0x14c   : > { %588 = vmatmul.mubr.msk.bf16.vlgmr.msra.gmra.mrb[0].mxu1 %vm371_vm0, %v715_v12 }
 0x21e   : > { %v412_v13 = vpop.f32.mrb[0].mxu0 }
 0x21f   : > { %v422_v14 = vpop.f32.mrb[0].mxu1  ;;  %v414_v15 = vpop.f32.mrb[1].mxu0 }
 0x220   : > { %v599_v16 = vpack.c.bf16 %v414_v15, %v412_v13  ;;  %v424_v17 = vpop.f32.mrb[1].mxu1  ;;  %v416_v18 = vpop.f32.mrb[2].mxu0 }
 0x221   : > { %v601_v19 = vpack.c.bf16 %v424_v17, %v422_v14  ;;  %v426_v20 = vpop.f32.mrb[2].mxu1  ;;  %v418_v21 = vpop.f32.mrb[3].mxu0 }
 0x222   : > { %455 = vst [vmem:[%s186_s5] sm:$0xff] %v599_v16  ;;  %v600_v22 = vpack.c.bf16 %v418_v21, %v416_v18  ;;  %v428_v23 = vpop.f32.mrb[3].mxu1 }
 0x223   : > { %457 = vst [vmem:[%s186_s5 + $0x10] sm:$0xff] %v601_v19  ;;  %v602_v24 = vpack.c.bf16 %v428_v23, %v426_v20 }
 0x224   : > { %456 = vst [vmem:[%s186_s5 + $0x8] sm:$0xff] %v600_v22 }
 0x225   : > { %458 = vst [vmem:[%s186_s5 + $0x18] sm:$0xff] %v602_v24 }
 0x226   : > { %759 = shalt.err (!%p756_p4)
}
 0x227   : > { %s760_s19 = scalar_lea.hbm %s1131_s16, 512  ;;  %s764_s26 = scalar_lea.hbm %s1178_s3, 1024 }
 0x228   : > { %p761_p5 = scmp.ne.s32.totalorder %s1131_s16, %s760_s19  ;;  %p765_p0 = scmp.lt.u32.totalorder %s1131_s16, %s1178_s3 }
 0x229   : > { %p766_p1 = scmp.lt.u32.totalorder %s764_s26, %s760_s19  ;;  %p768_p6 = scmp.lt.u32.totalorder %s760_s19, %s1131_s16 }
 0x22a   : > { %p762_p8 = pnand %p761_p5, %p1205_p11 }
 0x22b   : > { %p767_p3 = por %p766_p1, %p765_p0 }
 0x22c   : > { %p763_p9 = pneg %p762_p8 }
 0x22d   : > { %p769_p12 = por %p768_p6, %p767_p3 }
 0x22f   : > { %p770_p13 = pnand %p769_p12, %p763_p9 }
 0x231   : > { %773 = shalt.err (!%p770_p13)
}
 0x232   : > { %s827_s30 = smov 128   ;;  %s828_s5 = smov 8  }
 0x233   : > { %616 = dma.vmem_to_hbm [thread:$0]  (%p1205_p11), %s1126_s9, 512, %s1131_s16, %s460_s7, %s827_s30, %s827_s30, %s828_s5  }
 0x234 PF: > { %s488_s4 = sand.u32 1, %s800_s12   ;;  %p1206_p7 = scmp.ne.s32.totalorder %s1183_s25, 0 }
 0x235   : > { %p1207_p10 = scmp.ge.s32.totalorder %s812_s15, 2  ;;  %s489_s6 = scalar_lea.sflag [#allocation4], %s488_s4 }
 0x237   : > { %p623_p2 = pnand %p1207_p10, %p1206_p7 }
 0x239   : > { %795 = dma.done.wait (!%p623_p2), %s489_s6, 512  }
 0x23a   : > { %797 = vsyncadd (!%p623_p2), %s489_s6, 4294966784  ;;  %p16_p4 = scmp.ge.s32.totalorder %s874_s18, 4   ;;  %s1208_s12 = smov %s804_s13 }
 0x23b   : > { %s1209_s13 = smov %s808_s14  ;;  %s1210_s14 = smov %s886_s21 }
 0x23c   : > { %s1211_s15 = smov %s874_s18  ;;  %18 = sbr.rel (!%p16_p4) target bundleno = 5 (0x5), region = 77 }
 0x243   :  { %494 = vsyncpa [#allocation3], 1 }
 0x244   :  { %496 = vsyncpa [#allocation3 + $0x1], 1 }
 0x245   :  { %497 = vsyncpa [#allocation4], 1 }
 0x246   :  { %499 = vsyncpa [#allocation4 + $0x1], 1 }

</bundles_post_ra>
